<compile_context>
chip_gen: v7x
topology: tpu7x:2x2x1
jax: 0.10.0
libtpu: 0.0.40
codegen_flags: <defaults>
</compile_context>

<pallas_src>
import jax
import jax.numpy as jnp
from jax.experimental import pallas as pl
from jax.experimental.pallas import tpu as pltpu


def _round_up(x, m):
    return ((x + m - 1) // m) * m


def oclnn_kernel(p_ref, wc_ref, bc_ref, w0_ref, w1_ref, bl_ref, out_ref):
    # p_ref : (L*Bp, Kp) bf16  patches, row = l*Bp + b        (zero padded)
    # wc_ref: (Kp, Op)   bf16  conv weight as matmul operand  (zero padded)
    # bc_ref: (1, Op)    f32   conv bias                      (zero padded)
    # w0/w1 : (L*Bp, Op) f32   per-class linear weight, lane dense,
    #                          w_j[l*Bp + b, o] = lin_w[j, o*L + l]
    # bl_ref: (1, 2)     f32   linear bias
    # out   : (Bp, 2)    f32   logits (rows >= B are padding)
    Bp = out_ref.shape[0]
    Op = wc_ref.shape[1]
    L = p_ref.shape[0] // Bp

    # Conv1d with kernel == stride: every output position at once as a single
    # bf16 MXU matmul with f32 accumulation.
    h = jnp.dot(p_ref[...], wc_ref[...], preferred_element_type=jnp.float32)
    h = jnp.maximum(h + bc_ref[...], 0.0)               # (L*Bp, Op); ReLU
    # Dropout(p=0.25) is identity at inference time.

    # Fused flatten + Linear on the VPU:
    #   out[b, j] = sum_{l,o} h[l*Bp + b, o] * w_j[l*Bp + b, o]
    # Padded O-columns of h are exactly 0 (zero weights + zero bias), so the
    # padded lanes contribute nothing.  Padded batch rows are garbage but are
    # sliced off in the wrapper.
    acc0 = jnp.zeros((Bp, Op), jnp.float32)
    acc1 = jnp.zeros((Bp, Op), jnp.float32)
    for l in range(L):                                   # static unroll, L small
        lo, hi = l * Bp, (l + 1) * Bp
        h_l = h[lo:hi, :]                                # (Bp, Op) aligned slice
        acc0 = acc0 + h_l * w0_ref[lo:hi, :]
        acc1 = acc1 + h_l * w1_ref[lo:hi, :]
    o0 = jnp.sum(acc0, axis=1, keepdims=True)            # (Bp, 1) lane reduce
    o1 = jnp.sum(acc1, axis=1, keepdims=True)
    col = jax.lax.broadcasted_iota(jnp.int32, (Bp, 2), 1)
    out_ref[...] = jnp.where(col == 0, o0, o1) + bl_ref[...]


def make_oclnn_forward(conv_w, conv_b, lin_w, lin_b, max_batch):
    """Packs weights once (init time) and returns a jitted forward(x)."""
    O, C, div = conv_w.shape
    n_classes, OL = lin_w.shape
    assert n_classes == 2
    L = OL // O
    K = C * div

    Bp = _round_up(max(max_batch, 1), 8)
    Kp = _round_up(K, 128)
    Op = _round_up(O, 128)

    # ---- one-time weight packing (NOT on the per-call path) ----------------
    # Conv weight as a (Kp, Op) bf16 matmul operand; bias as (1, Op) f32.
    wc = jnp.pad(conv_w.astype(jnp.float32).reshape(O, K).T,
                 ((0, Kp - K), (0, Op - O))).astype(jnp.bfloat16)
    bc = jnp.pad(conv_b.astype(jnp.float32).reshape(1, O),
                 ((0, 0), (0, Op - O)))
    # PyTorch flattens the conv output (B, O, L) o-major (column = o*L + l).
    # Lane-dense re-layout + broadcast over the padded batch so the kernel is
    # a pure same-shape VPU multiply: w_j[l*Bp + b, o] = lin_w[j, o*L + l].
    wl = lin_w.astype(jnp.float32).reshape(2, O, L).transpose(0, 2, 1)   # (2,L,O)
    wl = jnp.pad(wl, ((0, 0), (0, 0), (0, Op - O)))                       # (2,L,Op)
    wl = jnp.broadcast_to(wl[:, :, None, :], (2, L, Bp, Op)).reshape(2, L * Bp, Op)
    w0 = jnp.asarray(wl[0])
    w1 = jnp.asarray(wl[1])
    bl = lin_b.astype(jnp.float32).reshape(1, 2)

    flops = 2 * (L * Bp) * Kp * Op + 4 * L * Bp * Op
    bytes_accessed = (2 * (L * Bp * Kp + Kp * Op)                 # bf16 inputs
                      + 4 * (Op + 2 * L * Bp * Op + 2 + Bp * 2))  # f32 rest
    cost = pl.CostEstimate(flops=flops, transcendentals=0,
                           bytes_accessed=bytes_accessed)

    @jax.jit
    def forward(x):
        B, Cx, T = x.shape
        assert Cx == C and B <= Bp
        assert (T - div) // div + 1 >= L        # PyTorch Conv1d tail truncation
        x32 = x.astype(jnp.float32)

        # Patch extraction -> (L*Bp, Kp) bf16, row = l*Bp + b; single
        # materialization (transpose fuses into the dynamic_update_slice).
        core = x32[:, :, :L * div].reshape(B, C, L, div)
        core = jnp.transpose(core, (2, 0, 1, 3)).reshape(L, B, K)
        core = core.astype(jnp.bfloat16)
        patches = jax.lax.dynamic_update_slice(
            jnp.zeros((L, Bp, Kp), jnp.bfloat16), core, (0, 0, 0))
        patches = patches.reshape(L * Bp, Kp)

        out = pl.pallas_call(
            oclnn_kernel,
            out_shape=jax.ShapeDtypeStruct((Bp, 2), jnp.float32),
            # No grid: single invocation, full-array VMEM-resident blocks,
            # no dead double-buffering.
            in_specs=[pl.BlockSpec(memory_space=pltpu.MemorySpace.VMEM)
                      for _ in range(6)],
            out_specs=pl.BlockSpec(memory_space=pltpu.MemorySpace.VMEM),
            cost_estimate=cost,
        )(patches, wc, bc, w0, w1, bl)
        return out[:B]

    return forward


def oclnn_reference(x, conv_w, conv_b, lin_w, lin_b):
    """Pure-JAX f32 mimic of the PyTorch forward (NCW conv1d, o-major flatten)."""
    B, C, T = x.shape
    O, _, div = conv_w.shape
    L = (T - div) // div + 1
    xt = x[:, :, : L * div].reshape(B, C, L, div)
    conv = jnp.einsum('bcld,ocd->bol', xt, conv_w) + conv_b[None, :, None]
    h = jnp.maximum(conv, 0.0)                  # ReLU (dropout = identity)
    flat = h.reshape(B, O * L)                  # PyTorch x.view(B, -1)
    return flat @ lin_w.T + lin_b[None, :]


if __name__ == "__main__":
    # Small shapes consistent with the module: n_channels=8, n_samples=120
    # => div = 120 // 15 = 8, conv output length L = 15, flatten size 16*15=240.
    B, C, T = 4, 8, 120
    O = 16
    div = T // 15
    L = T // div

    key = jax.random.PRNGKey(0)
    kx, kcw, kcb, klw, klb = jax.random.split(key, 5)

    x = jax.random.normal(kx, (B, C, T), dtype=jnp.float32)
    conv_w = 0.1 * jax.random.normal(kcw, (O, C, div), dtype=jnp.float32)
    conv_b = 0.1 * jax.random.normal(kcb, (O,), dtype=jnp.float32)
    lin_w = 0.1 * jax.random.normal(klw, (2, O * L), dtype=jnp.float32)
    lin_b = 0.1 * jax.random.normal(klb, (2,), dtype=jnp.float32)

    forward = make_oclnn_forward(conv_w, conv_b, lin_w, lin_b, max_batch=B)
    out = jax.block_until_ready(forward(x))

    ref = oclnn_reference(x, conv_w, conv_b, lin_w, lin_b)
    assert out.shape == (B, 2)
    # bf16 MXU inputs -> relaxed tolerance vs. the f32 reference.
    assert jnp.allclose(out, ref, atol=2e-2, rtol=2e-2), (out, ref)

    print("KERNEL_OK")
</pallas_src>

<mosaic_0001>
module attributes {stable_mosaic.version = 11 : i64} {
  func.func @oclnn_kernel(%arg0: memref<120x128xbf16, #tpu.memory_space<vmem>>, %arg1: memref<128x128xbf16, #tpu.memory_space<vmem>>, %arg2: memref<1x128xf32, #tpu.memory_space<vmem>>, %arg3: memref<120x128xf32, #tpu.memory_space<vmem>>, %arg4: memref<120x128xf32, #tpu.memory_space<vmem>>, %arg5: memref<1x2xf32, #tpu.memory_space<vmem>>, %arg6: memref<8x2xf32, #tpu.memory_space<vmem>>) attributes {dimension_semantics = [], scalar_prefetch = 0 : i64, scratch_operands = 0 : i64, tpu.core_type = #tpu.core_type<tc>} {
    %c0 = arith.constant 0 : index
    %c0_0 = arith.constant 0 : index
    %0 = vector.load %arg0[%c0, %c0_0] : memref<120x128xbf16, #tpu.memory_space<vmem>>, vector<120x128xbf16>
    %c0_1 = arith.constant 0 : index
    %c0_2 = arith.constant 0 : index
    %1 = vector.load %arg1[%c0_1, %c0_2] : memref<128x128xbf16, #tpu.memory_space<vmem>>, vector<128x128xbf16>
    %cst = arith.constant dense<0.000000e+00> : vector<120x128xf32>
    %2 = tpu.matmul %0, %1, %cst {dimension_numbers = #tpu.dot_dimension_numbers<[1], [0], [0], [1], [0, 0, 1, 1], [], []>} : vector<120x128xbf16>, vector<128x128xbf16>, vector<120x128xf32> -> vector<120x128xf32>
    %c0_3 = arith.constant 0 : index
    %c0_4 = arith.constant 0 : index
    %3 = vector.load %arg2[%c0_3, %c0_4] : memref<1x128xf32, #tpu.memory_space<vmem>>, vector<1x128xf32>
    %4 = vector.broadcast %3 : vector<1x128xf32> to vector<120x128xf32>
    %5 = arith.addf %2, %4 : vector<120x128xf32>
    %cst_5 = arith.constant 0.000000e+00 : f32
    %6 = vector.broadcast %cst_5 : f32 to vector<120x128xf32>
    %7 = arith.maximumf %5, %6 : vector<120x128xf32>
    %cst_6 = arith.constant 0.000000e+00 : f32
    %8 = vector.broadcast %cst_6 : f32 to vector<8x128xf32>
    %cst_7 = arith.constant 0.000000e+00 : f32
    %9 = vector.broadcast %cst_7 : f32 to vector<8x128xf32>
    %10 = vector.extract_strided_slice %7 {offsets = [0, 0], sizes = [8, 128], strides = [1, 1]} : vector<120x128xf32> to vector<8x128xf32>
    %c0_8 = arith.constant 0 : index
    %c0_9 = arith.constant 0 : index
    %11 = vector.load %arg3[%c0_8, %c0_9] : memref<120x128xf32, #tpu.memory_space<vmem>>, vector<8x128xf32>
    %12 = arith.mulf %10, %11 : vector<8x128xf32>
    %13 = arith.addf %8, %12 : vector<8x128xf32>
    %c0_10 = arith.constant 0 : index
    %c0_11 = arith.constant 0 : index
    %14 = vector.load %arg4[%c0_10, %c0_11] : memref<120x128xf32, #tpu.memory_space<vmem>>, vector<8x128xf32>
    %15 = arith.mulf %10, %14 : vector<8x128xf32>
    %16 = arith.addf %9, %15 : vector<8x128xf32>
    %17 = vector.extract_strided_slice %7 {offsets = [8, 0], sizes = [8, 128], strides = [1, 1]} : vector<120x128xf32> to vector<8x128xf32>
    %c8 = arith.constant 8 : index
    %c0_12 = arith.constant 0 : index
    %18 = vector.load %arg3[%c8, %c0_12] : memref<120x128xf32, #tpu.memory_space<vmem>>, vector<8x128xf32>
    %19 = arith.mulf %17, %18 : vector<8x128xf32>
    %20 = arith.addf %13, %19 : vector<8x128xf32>
    %c8_13 = arith.constant 8 : index
    %c0_14 = arith.constant 0 : index
    %21 = vector.load %arg4[%c8_13, %c0_14] : memref<120x128xf32, #tpu.memory_space<vmem>>, vector<8x128xf32>
    %22 = arith.mulf %17, %21 : vector<8x128xf32>
    %23 = arith.addf %16, %22 : vector<8x128xf32>
    %24 = vector.extract_strided_slice %7 {offsets = [16, 0], sizes = [8, 128], strides = [1, 1]} : vector<120x128xf32> to vector<8x128xf32>
    %c16 = arith.constant 16 : index
    %c0_15 = arith.constant 0 : index
    %25 = vector.load %arg3[%c16, %c0_15] : memref<120x128xf32, #tpu.memory_space<vmem>>, vector<8x128xf32>
    %26 = arith.mulf %24, %25 : vector<8x128xf32>
    %27 = arith.addf %20, %26 : vector<8x128xf32>
    %c16_16 = arith.constant 16 : index
    %c0_17 = arith.constant 0 : index
    %28 = vector.load %arg4[%c16_16, %c0_17] : memref<120x128xf32, #tpu.memory_space<vmem>>, vector<8x128xf32>
    %29 = arith.mulf %24, %28 : vector<8x128xf32>
    %30 = arith.addf %23, %29 : vector<8x128xf32>
    %31 = vector.extract_strided_slice %7 {offsets = [24, 0], sizes = [8, 128], strides = [1, 1]} : vector<120x128xf32> to vector<8x128xf32>
    %c24 = arith.constant 24 : index
    %c0_18 = arith.constant 0 : index
    %32 = vector.load %arg3[%c24, %c0_18] : memref<120x128xf32, #tpu.memory_space<vmem>>, vector<8x128xf32>
    %33 = arith.mulf %31, %32 : vector<8x128xf32>
    %34 = arith.addf %27, %33 : vector<8x128xf32>
    %c24_19 = arith.constant 24 : index
    %c0_20 = arith.constant 0 : index
    %35 = vector.load %arg4[%c24_19, %c0_20] : memref<120x128xf32, #tpu.memory_space<vmem>>, vector<8x128xf32>
    %36 = arith.mulf %31, %35 : vector<8x128xf32>
    %37 = arith.addf %30, %36 : vector<8x128xf32>
    %38 = vector.extract_strided_slice %7 {offsets = [32, 0], sizes = [8, 128], strides = [1, 1]} : vector<120x128xf32> to vector<8x128xf32>
    %c32 = arith.constant 32 : index
    %c0_21 = arith.constant 0 : index
    %39 = vector.load %arg3[%c32, %c0_21] : memref<120x128xf32, #tpu.memory_space<vmem>>, vector<8x128xf32>
    %40 = arith.mulf %38, %39 : vector<8x128xf32>
    %41 = arith.addf %34, %40 : vector<8x128xf32>
    %c32_22 = arith.constant 32 : index
    %c0_23 = arith.constant 0 : index
    %42 = vector.load %arg4[%c32_22, %c0_23] : memref<120x128xf32, #tpu.memory_space<vmem>>, vector<8x128xf32>
    %43 = arith.mulf %38, %42 : vector<8x128xf32>
    %44 = arith.addf %37, %43 : vector<8x128xf32>
    %45 = vector.extract_strided_slice %7 {offsets = [40, 0], sizes = [8, 128], strides = [1, 1]} : vector<120x128xf32> to vector<8x128xf32>
    %c40 = arith.constant 40 : index
    %c0_24 = arith.constant 0 : index
    %46 = vector.load %arg3[%c40, %c0_24] : memref<120x128xf32, #tpu.memory_space<vmem>>, vector<8x128xf32>
    %47 = arith.mulf %45, %46 : vector<8x128xf32>
    %48 = arith.addf %41, %47 : vector<8x128xf32>
    %c40_25 = arith.constant 40 : index
    %c0_26 = arith.constant 0 : index
    %49 = vector.load %arg4[%c40_25, %c0_26] : memref<120x128xf32, #tpu.memory_space<vmem>>, vector<8x128xf32>
    %50 = arith.mulf %45, %49 : vector<8x128xf32>
    %51 = arith.addf %44, %50 : vector<8x128xf32>
    %52 = vector.extract_strided_slice %7 {offsets = [48, 0], sizes = [8, 128], strides = [1, 1]} : vector<120x128xf32> to vector<8x128xf32>
    %c48 = arith.constant 48 : index
    %c0_27 = arith.constant 0 : index
    %53 = vector.load %arg3[%c48, %c0_27] : memref<120x128xf32, #tpu.memory_space<vmem>>, vector<8x128xf32>
    %54 = arith.mulf %52, %53 : vector<8x128xf32>
    %55 = arith.addf %48, %54 : vector<8x128xf32>
    %c48_28 = arith.constant 48 : index
    %c0_29 = arith.constant 0 : index
    %56 = vector.load %arg4[%c48_28, %c0_29] : memref<120x128xf32, #tpu.memory_space<vmem>>, vector<8x128xf32>
    %57 = arith.mulf %52, %56 : vector<8x128xf32>
    %58 = arith.addf %51, %57 : vector<8x128xf32>
    %59 = vector.extract_strided_slice %7 {offsets = [56, 0], sizes = [8, 128], strides = [1, 1]} : vector<120x128xf32> to vector<8x128xf32>
    %c56 = arith.constant 56 : index
    %c0_30 = arith.constant 0 : index
    %60 = vector.load %arg3[%c56, %c0_30] : memref<120x128xf32, #tpu.memory_space<vmem>>, vector<8x128xf32>
    %61 = arith.mulf %59, %60 : vector<8x128xf32>
    %62 = arith.addf %55, %61 : vector<8x128xf32>
    %c56_31 = arith.constant 56 : index
    %c0_32 = arith.constant 0 : index
    %63 = vector.load %arg4[%c56_31, %c0_32] : memref<120x128xf32, #tpu.memory_space<vmem>>, vector<8x128xf32>
    %64 = arith.mulf %59, %63 : vector<8x128xf32>
    %65 = arith.addf %58, %64 : vector<8x128xf32>
    %66 = vector.extract_strided_slice %7 {offsets = [64, 0], sizes = [8, 128], strides = [1, 1]} : vector<120x128xf32> to vector<8x128xf32>
    %c64 = arith.constant 64 : index
    %c0_33 = arith.constant 0 : index
    %67 = vector.load %arg3[%c64, %c0_33] : memref<120x128xf32, #tpu.memory_space<vmem>>, vector<8x128xf32>
    %68 = arith.mulf %66, %67 : vector<8x128xf32>
    %69 = arith.addf %62, %68 : vector<8x128xf32>
    %c64_34 = arith.constant 64 : index
    %c0_35 = arith.constant 0 : index
    %70 = vector.load %arg4[%c64_34, %c0_35] : memref<120x128xf32, #tpu.memory_space<vmem>>, vector<8x128xf32>
    %71 = arith.mulf %66, %70 : vector<8x128xf32>
    %72 = arith.addf %65, %71 : vector<8x128xf32>
    %73 = vector.extract_strided_slice %7 {offsets = [72, 0], sizes = [8, 128], strides = [1, 1]} : vector<120x128xf32> to vector<8x128xf32>
    %c72 = arith.constant 72 : index
    %c0_36 = arith.constant 0 : index
    %74 = vector.load %arg3[%c72, %c0_36] : memref<120x128xf32, #tpu.memory_space<vmem>>, vector<8x128xf32>
    %75 = arith.mulf %73, %74 : vector<8x128xf32>
    %76 = arith.addf %69, %75 : vector<8x128xf32>
    %c72_37 = arith.constant 72 : index
    %c0_38 = arith.constant 0 : index
    %77 = vector.load %arg4[%c72_37, %c0_38] : memref<120x128xf32, #tpu.memory_space<vmem>>, vector<8x128xf32>
    %78 = arith.mulf %73, %77 : vector<8x128xf32>
    %79 = arith.addf %72, %78 : vector<8x128xf32>
    %80 = vector.extract_strided_slice %7 {offsets = [80, 0], sizes = [8, 128], strides = [1, 1]} : vector<120x128xf32> to vector<8x128xf32>
    %c80 = arith.constant 80 : index
    %c0_39 = arith.constant 0 : index
    %81 = vector.load %arg3[%c80, %c0_39] : memref<120x128xf32, #tpu.memory_space<vmem>>, vector<8x128xf32>
    %82 = arith.mulf %80, %81 : vector<8x128xf32>
    %83 = arith.addf %76, %82 : vector<8x128xf32>
    %c80_40 = arith.constant 80 : index
    %c0_41 = arith.constant 0 : index
    %84 = vector.load %arg4[%c80_40, %c0_41] : memref<120x128xf32, #tpu.memory_space<vmem>>, vector<8x128xf32>
    %85 = arith.mulf %80, %84 : vector<8x128xf32>
    %86 = arith.addf %79, %85 : vector<8x128xf32>
    %87 = vector.extract_strided_slice %7 {offsets = [88, 0], sizes = [8, 128], strides = [1, 1]} : vector<120x128xf32> to vector<8x128xf32>
    %c88 = arith.constant 88 : index
    %c0_42 = arith.constant 0 : index
    %88 = vector.load %arg3[%c88, %c0_42] : memref<120x128xf32, #tpu.memory_space<vmem>>, vector<8x128xf32>
    %89 = arith.mulf %87, %88 : vector<8x128xf32>
    %90 = arith.addf %83, %89 : vector<8x128xf32>
    %c88_43 = arith.constant 88 : index
    %c0_44 = arith.constant 0 : index
    %91 = vector.load %arg4[%c88_43, %c0_44] : memref<120x128xf32, #tpu.memory_space<vmem>>, vector<8x128xf32>
    %92 = arith.mulf %87, %91 : vector<8x128xf32>
    %93 = arith.addf %86, %92 : vector<8x128xf32>
    %94 = vector.extract_strided_slice %7 {offsets = [96, 0], sizes = [8, 128], strides = [1, 1]} : vector<120x128xf32> to vector<8x128xf32>
    %c96 = arith.constant 96 : index
    %c0_45 = arith.constant 0 : index
    %95 = vector.load %arg3[%c96, %c0_45] : memref<120x128xf32, #tpu.memory_space<vmem>>, vector<8x128xf32>
    %96 = arith.mulf %94, %95 : vector<8x128xf32>
    %97 = arith.addf %90, %96 : vector<8x128xf32>
    %c96_46 = arith.constant 96 : index
    %c0_47 = arith.constant 0 : index
    %98 = vector.load %arg4[%c96_46, %c0_47] : memref<120x128xf32, #tpu.memory_space<vmem>>, vector<8x128xf32>
    %99 = arith.mulf %94, %98 : vector<8x128xf32>
    %100 = arith.addf %93, %99 : vector<8x128xf32>
    %101 = vector.extract_strided_slice %7 {offsets = [104, 0], sizes = [8, 128], strides = [1, 1]} : vector<120x128xf32> to vector<8x128xf32>
    %c104 = arith.constant 104 : index
    %c0_48 = arith.constant 0 : index
    %102 = vector.load %arg3[%c104, %c0_48] : memref<120x128xf32, #tpu.memory_space<vmem>>, vector<8x128xf32>
    %103 = arith.mulf %101, %102 : vector<8x128xf32>
    %104 = arith.addf %97, %103 : vector<8x128xf32>
    %c104_49 = arith.constant 104 : index
    %c0_50 = arith.constant 0 : index
    %105 = vector.load %arg4[%c104_49, %c0_50] : memref<120x128xf32, #tpu.memory_space<vmem>>, vector<8x128xf32>
    %106 = arith.mulf %101, %105 : vector<8x128xf32>
    %107 = arith.addf %100, %106 : vector<8x128xf32>
    %108 = vector.extract_strided_slice %7 {offsets = [112, 0], sizes = [8, 128], strides = [1, 1]} : vector<120x128xf32> to vector<8x128xf32>
    %c112 = arith.constant 112 : index
    %c0_51 = arith.constant 0 : index
    %109 = vector.load %arg3[%c112, %c0_51] : memref<120x128xf32, #tpu.memory_space<vmem>>, vector<8x128xf32>
    %110 = arith.mulf %108, %109 : vector<8x128xf32>
    %111 = arith.addf %104, %110 : vector<8x128xf32>
    %c112_52 = arith.constant 112 : index
    %c0_53 = arith.constant 0 : index
    %112 = vector.load %arg4[%c112_52, %c0_53] : memref<120x128xf32, #tpu.memory_space<vmem>>, vector<8x128xf32>
    %113 = arith.mulf %108, %112 : vector<8x128xf32>
    %114 = arith.addf %107, %113 : vector<8x128xf32>
    %cst_54 = arith.constant dense<0.000000e+00> : vector<8xf32>
    %115 = vector.multi_reduction <add>, %111, %cst_54 [1] : vector<8x128xf32> to vector<8xf32>
    %116 = vector.shape_cast %115 : vector<8xf32> to vector<8x1xf32>
    %cst_55 = arith.constant dense<0.000000e+00> : vector<8xf32>
    %117 = vector.multi_reduction <add>, %114, %cst_55 [1] : vector<8x128xf32> to vector<8xf32>
    %118 = vector.shape_cast %117 : vector<8xf32> to vector<8x1xf32>
    %119 = tpu.iota {dimensions = array<i32: 1>} : vector<8x2xi32>
    %c0_i32 = arith.constant 0 : i32
    %120 = vector.broadcast %c0_i32 : i32 to vector<8x2xi32>
    %121 = arith.cmpi eq, %119, %120 : vector<8x2xi32>
    %122 = vector.shape_cast %116 : vector<8x1xf32> to vector<8x1xf32>
    %123 = vector.broadcast %122 : vector<8x1xf32> to vector<8x2xf32>
    %124 = vector.shape_cast %118 : vector<8x1xf32> to vector<8x1xf32>
    %125 = vector.broadcast %124 : vector<8x1xf32> to vector<8x2xf32>
    %126 = arith.select %121, %123, %125 : vector<8x2xi1>, vector<8x2xf32>
    %c0_56 = arith.constant 0 : index
    %c0_57 = arith.constant 0 : index
    %127 = vector.load %arg5[%c0_56, %c0_57] : memref<1x2xf32, #tpu.memory_space<vmem>>, vector<1x2xf32>
    %128 = vector.broadcast %127 : vector<1x2xf32> to vector<8x2xf32>
    %129 = arith.addf %126, %128 : vector<8x2xf32>
    %c0_58 = arith.constant 0 : index
    %c0_59 = arith.constant 0 : index
    %130 = vector.load %arg6[%c0_58, %c0_59] : memref<8x2xf32, #tpu.memory_space<vmem>>, vector<8x2xf32>
    tpu.vector_store %arg6[%c0_58, %c0_59], %129 {strides = array<i32>} : memref<8x2xf32, #tpu.memory_space<vmem>>, vector<8x2xf32>,
    return
  }
}

</mosaic_0001>

<bundles_post_ra>
// kernel: forward.1
= control target key start
LH: loop header
LB: loop body
LE: loop exit
PB: predicated region body
PF: predicated region fallthrough
CT: control target
= control target key end

     0   :  { %vm373_vm1 = vcmask 15360   ;;  %s685_s1 = inlined_call_operand.vmem [shape: bf16[128,128], index: 1, kind: input, shape index: {}]   ;;  %s686_s0 = inlined_call_operand.vmem [shape: bf16[120,128], index: 0, kind: input, shape index: {}]   ;;  %s687_s2 = inlined_call_operand.vmem [shape: f32[1,128], index: 2, kind: input, shape index: {}]   ;;  %s688_s3 = inlined_call_operand.vmem [shape: f32[120,128], index: 3, kind: input, shape index: {}]   ;;  %s689_s4 = inlined_call_operand.vmem [shape: f32[120,128], index: 4, kind: input, shape index: {}]   ;;  %s690_s5 = inlined_call_operand.vmem [shape: f32[1,2], index: 5, kind: input, shape index: {}]   ;;  %s691_s6 = inlined_call_operand.vmem [shape: f32[8,2], index: 6, kind: output, shape index: {}]  }
   0x1   :  { %v461_v0 = vld [vmem:[%s685_s1] sm:$0xff]   ;;  %v462_v1 = vld [vmem:[%s685_s1 + $0x8] sm:$0xff]   ;;  %v463_v2 = vld [vmem:[%s685_s1 + $0x10] sm:$0xff]  }
   0x2   :  { %413 = vmatprep.subr.bf16.mxu0 %v461_v0  ;;  %445 = vmatprep.subr.bf16.mxu1 %v461_v0  ;;  %v464_v3 = vld [vmem:[%s685_s1 + $0x18] sm:$0xff]   ;;  %v469_v4 = vld [vmem:[%s686_s0] sm:$0xff]   ;;  %v466_v7 = vld [vmem:[%s685_s1 + $0x28] sm:$0xff]  }
   0x3   :  { %414 = vmatpush3.bf16.msra.mxu0 %v461_v0  ;;  %453 = vmatpush3.bf16.msra.mxu1 %v461_v0  ;;  %v465_v5 = vld [vmem:[%s685_s1 + $0x20] sm:$0xff]   ;;  %v467_v8 = vld [vmem:[%s685_s1 + $0x30] sm:$0xff]   ;;  %v468_v9 = vld [vmem:[%s685_s1 + $0x38] sm:$0xff]  }
   0x4   :  { %415 = vmatprep.subr.bf16.mxu0 %v462_v1  ;;  %446 = vmatprep.subr.bf16.mxu1 %v462_v1  ;;  %v473_v6 = vld [vmem:[%s686_s0 + $0x20] sm:$0xff]   ;;  %v470_v10 = vld [vmem:[%s686_s0 + $0x8] sm:$0xff]   ;;  %v471_v12 = vld [vmem:[%s686_s0 + $0x10] sm:$0xff]  }
   0x5   :  { %429 = vmatprep.mubr.bf16.mxu0 %v469_v4  ;;  %437 = vmatprep.mubr.bf16.mxu1 %v473_v6  ;;  %v474_v11 = vld [vmem:[%s686_s0 + $0x28] sm:$0xff]   ;;  %v475_v13 = vld [vmem:[%s686_s0 + $0x30] sm:$0xff]   ;;  %v472_v14 = vld [vmem:[%s686_s0 + $0x18] sm:$0xff]  }
   0x6   :  { %v476_v15 = vld [vmem:[%s686_s0 + $0x38] ss:$0 sps:$4 sm:$0xff]   ;;  %v563_v16 = vld [vmem:[%s687_s2] ss:$0 sm:$0xff]  ;;  %v273_v33 = vld [vmem:[%s688_s3 + $0x8] sm:$0xff] }
   0x7   :  { %416 = vmatpush3.bf16.msra.mxu0 %v462_v1  ;;  %454 = vmatpush3.bf16.msra.mxu1 %v462_v1  ;;  %v267_v29 = vld [vmem:[%s688_s3] sm:$0xff]  ;;  %v276_v34 = vld [vmem:[%s689_s4 + $0x8] sm:$0xff]  ;;  %v279_v35 = vld [vmem:[%s688_s3 + $0x10] sm:$0xff] }
   0x8   :  { %417 = vmatprep.subr.bf16.mxu0 %v463_v2  ;;  %447 = vmatprep.subr.bf16.mxu1 %v463_v2  ;;  %v270_v32 = vld [vmem:[%s689_s4] sm:$0xff]  ;;  %v282_v37 = vld [vmem:[%s689_s4 + $0x10] sm:$0xff]  ;;  %v285_v41 = vld [vmem:[%s688_s3 + $0x18] sm:$0xff] }
   0x9   :  { %v288_v42 = vld [vmem:[%s689_s4 + $0x18] sm:$0xff]  ;;  %v291_v60 = vld [vmem:[%s688_s3 + $0x20] sm:$0xff] }
   0xa   :  { %v294_v61 = vld [vmem:[%s689_s4 + $0x20] sm:$0xff] }
   0xb   :  { %418 = vmatpush3.bf16.msra.mxu0 %v463_v2  ;;  %455 = vmatpush3.bf16.msra.mxu1 %v463_v2 }
   0xc   :  { %419 = vmatprep.subr.bf16.mxu0 %v464_v3  ;;  %448 = vmatprep.subr.bf16.mxu1 %v464_v3 }
   0xf   :  { %420 = vmatpush3.bf16.msra.mxu0 %v464_v3  ;;  %456 = vmatpush3.bf16.msra.mxu1 %v464_v3 }
  0x10   :  { %421 = vmatprep.subr.bf16.mxu0 %v465_v5  ;;  %449 = vmatprep.subr.bf16.mxu1 %v465_v5 }
  0x13   :  { %422 = vmatpush3.bf16.msra.mxu0 %v465_v5  ;;  %457 = vmatpush3.bf16.msra.mxu1 %v465_v5 }
  0x14   :  { %423 = vmatprep.subr.bf16.mxu0 %v466_v7  ;;  %450 = vmatprep.subr.bf16.mxu1 %v466_v7 }
  0x17   :  { %424 = vmatpush3.bf16.msra.mxu0 %v466_v7  ;;  %458 = vmatpush3.bf16.msra.mxu1 %v466_v7 }
  0x18   :  { %425 = vmatprep.subr.bf16.mxu0 %v467_v8  ;;  %451 = vmatprep.subr.bf16.mxu1 %v467_v8 }
  0x1b   :  { %426 = vmatpush3.bf16.msra.mxu0 %v467_v8  ;;  %459 = vmatpush3.bf16.msra.mxu1 %v467_v8 }
  0x1c   :  { %427 = vmatprep.subr.bf16.mxu0 %v468_v9  ;;  %452 = vmatprep.subr.bf16.mxu1 %v468_v9 }
  0x1f   :  { %428 = vmatpush3.bf16.msra.mxu0 %v468_v9  ;;  %460 = vmatpush3.bf16.msra.mxu1 %v468_v9  ;;  %v297_v9 = vld [vmem:[%s688_s3 + $0x28] sm:$0xff] }
  0x22   :  { %430 = vmatmul.mubr.bf16.vlgmr.msra.gmra.mrb[0].mxu0 %v470_v10  ;;  %438 = vmatmul.mubr.bf16.vlgmr.msra.gmra.mrb[0].mxu1 %v474_v11  ;;  %v300_v10 = vld [vmem:[%s689_s4 + $0x28] sm:$0xff] }
  0x23   :  { %433 = vmatprep.mubr.bf16.mxu0 %v471_v12  ;;  %441 = vmatprep.mubr.bf16.mxu1 %v475_v13 }
  0x2a   :  { %434 = vmatmul.mubr.bf16.gmra.mrb[4].mxu0 %v472_v14  ;;  %442 = vmatmul.mubr.bf16.gmra.mrb[4].mxu1 %v476_v15  ;;  %v303_v14 = vld [vmem:[%s688_s3 + $0x30] sm:$0xff] }
  0x2b   :  { %v306_v15 = vld [vmem:[%s689_s4 + $0x30] sm:$0xff] }
  0xf5   :  { %v431_v17 = vpop.f32.mrb[0].mxu0  ;;  %v565_v18 = vpop.f32.mrb[0].mxu1 }
  0xf6   :  { %v199_v19 = vadd.f32 %v431_v17, %v563_v16  ;;  %v190_v20 = vpop.f32.mrb[1].mxu0  ;;  %v222_v21 = vpop.f32.mrb[1].mxu1 }
  0xf7   :  { %v191_v22 = vadd.f32 %v563_v16, %v190_v20  ;;  %v432_v23 = vpop.f32.mrb[2].mxu0  ;;  %v569_v24 = vpop.f32.mrb[2].mxu1  ;;  %v223_v49 = vadd.f32 %v563_v16, %v222_v21 }
  0xf8   :  { %v202_v25 = vadd.f32 %v432_v23, %v563_v16  ;;  %v193_v26 = vpop.f32.mrb[3].mxu0  ;;  %v225_v27 = vpop.f32.mrb[3].mxu1  ;;  %v254_v31 = vmax.f32 %v199_v19, 0.0 }
  0xf9   :  { %v252_v28 = vmax.f32 %v191_v22, 0.0  ;;  %v194_v30 = vadd.f32 %v563_v16, %v193_v26  ;;  %v260_v13 = vmax.f32 %v223_v49, 0.0  ;;  %v226_v21 = vadd.f32 %v563_v16, %v225_v27  ;;  %v309_v22 = vld [vmem:[%s688_s3 + $0x38] sm:$0xff]  ;;  %v315_v26 = vld [vmem:[%s688_s3 + $0x40] sm:$0xff] }
  0xfa   :  { %v255_v38 = vmax.f32 %v202_v25, 0.0  ;;  %v280_v47 = vmul.f32 %v279_v35, %v254_v31  ;;  %v283_v51 = vmul.f32 %v282_v37, %v254_v31  ;;  %v231_v27 = vadd.f32 %v565_v18, %v563_v16 }
  0xfb   :  { %v253_v36 = vmax.f32 %v194_v30, 0.0  ;;  %v268_v39 = vmul.f32 %v267_v29, %v252_v28  ;;  %v271_v40 = vmul.f32 %v270_v32, %v252_v28  ;;  %v318_v28 = vld [vmem:[%s689_s4 + $0x40] sm:$0xff]  ;;  %v312_v29 = vld [vmem:[%s689_s4 + $0x38] sm:$0xff]  ;;  %v234_v30 = vadd.f32 %v569_v24, %v563_v16  ;;  %v324_v24 = vld [vmem:[%s689_s4 + $0x48] sm:$0xff] }
  0xfc   :  { %v286_v57 = vmul.f32 %v285_v41, %v255_v38  ;;  %v289_v58 = vmul.f32 %v288_v42, %v255_v38  ;;  %v319_v37 = vmul.f32 %v318_v28, %v260_v13  ;;  %v261_v38 = vmax.f32 %v226_v21, 0.0  ;;  %v321_v42 = vld [vmem:[%s688_s3 + $0x48] sm:$0xff] }
  0xfd   :  { %v274_v43 = vmul.f32 %v273_v33, %v253_v36  ;;  %v277_v44 = vmul.f32 %v276_v34, %v253_v36  ;;  %v435_v45 = vpop.f32.mrb[4].mxu0  ;;  %v597_v46 = vpop.f32.mrb[4].mxu1  ;;  %v316_v36 = vmul.f32 %v315_v26, %v260_v13  ;;  %v263_v49 = vmax.f32 %v234_v30, 0.0 }
  0xfe   :  { %v206_v48 = vpop.f32.mrb[5].mxu0  ;;  %v238_v50 = vpop.f32.mrb[5].mxu1  ;;  %v215_v59 = vadd.f32 %v435_v45, %v563_v16  ;;  %v361_v26 = vlaneseq }
  0xff   :  { %v275_v52 = vadd.f32 %v274_v43, %v268_v39  ;;  %v278_v53 = vadd.f32 %v277_v44, %v271_v40  ;;  %v207_v54 = vadd.f32 %v563_v16, %v206_v48  ;;  %v436_v55 = vpop.f32.mrb[6].mxu0  ;;  %v444_v56 = vpop.f32.mrb[6].mxu1  ;;  %v239_v18 = vadd.f32 %v563_v16, %v238_v50  ;;  %v327_v44 = vld [vmem:[%s688_s3 + $0x50] sm:$0xff] }
 0x100   :  { %v218_v62 = vadd.f32 %v436_v55, %v563_v16  ;;  %v209_v63 = vpop.f32.mrb[7].mxu0  ;;  %v241_v0 = vpop.f32.mrb[7].mxu1  ;;  %v258_v11 = vmax.f32 %v215_v59, 0.0  ;;  %v262_v43 = vmax.f32 %v231_v27, 0.0  ;;  %v330_v48 = vld [vmem:[%s689_s4 + $0x50] sm:$0xff]  ;;  %v336_v55 = vld [vmem:[%s689_s4 + $0x58] sm:$0xff]  ;;  %v325_v56 = vmul.f32 %v324_v24, %v261_v38 }
 0x101   :  { %v281_v1 = vadd.f32 %v280_v47, %v275_v52  ;;  %v284_v2 = vadd.f32 %v283_v51, %v278_v53  ;;  %v256_v3 = vmax.f32 %v207_v54, 0.0  ;;  %v210_v4 = vadd.f32 %v563_v16, %v209_v63  ;;  %v333_v54 = vld [vmem:[%s688_s3 + $0x58] sm:$0xff]  ;;  %v339_v59 = vld [vmem:[%s688_s3 + $0x60] sm:$0xff] }
 0x102   :  { %v259_v20 = vmax.f32 %v218_v62, 0.0  ;;  %v304_v31 = vmul.f32 %v303_v14, %v258_v11  ;;  %v307_v32 = vmul.f32 %v306_v15, %v258_v11  ;;  %v322_v51 = vmul.f32 %v321_v42, %v261_v38  ;;  %v396_v27 = vld [vmem:[%s690_s5] ss:$0 sm:$0xff] }
 0x103   :  { %v287_v5 = vadd.f32 %v286_v57, %v281_v1  ;;  %v290_v6 = vadd.f32 %v289_v58, %v284_v2  ;;  %v292_v7 = vmul.f32 %v291_v60, %v256_v3  ;;  %v295_v8 = vmul.f32 %v294_v61, %v256_v3  ;;  %v342_v60 = vld [vmem:[%s689_s4 + $0x60] sm:$0xff] }
 0x104   :  { %v257_v12 = vmax.f32 %v210_v4, 0.0  ;;  %v310_v35 = vmul.f32 %v309_v22, %v259_v20  ;;  %v313_v39 = vmul.f32 %v312_v29, %v259_v20  ;;  %v242_v52 = vadd.f32 %v563_v16, %v241_v0 }
 0x105   :  { %v293_v17 = vadd.f32 %v292_v7, %v287_v5  ;;  %v296_v19 = vadd.f32 %v295_v8, %v290_v6  ;;  %v264_v57 = vmax.f32 %v239_v18, 0.0  ;;  %v328_v58 = vmul.f32 %v327_v44, %v262_v43  ;;  %v345_v8 = vld [vmem:[%s688_s3 + $0x68] sm:$0xff] }
 0x106   :  { %v298_v23 = vmul.f32 %v297_v9, %v257_v12  ;;  %v301_v25 = vmul.f32 %v300_v10, %v257_v12  ;;  %v331_v61 = vmul.f32 %v330_v48, %v262_v43  ;;  %v247_v0 = vadd.f32 %v597_v46, %v563_v16  ;;  %v348_v9 = vld [vmem:[%s689_s4 + $0x68] sm:$0xff]  ;;  %v354_v16 = vld [vmem:[%s689_s4 + $0x70] sm:$0xff] }
 0x107   :  { %v334_v1 = vmul.f32 %v333_v54, %v263_v49  ;;  %v337_v2 = vmul.f32 %v336_v55, %v263_v49  ;;  %v265_v3 = vmax.f32 %v242_v52, 0.0  ;;  %v340_v6 = vmul.f32 %v339_v59, %v264_v57  ;;  %v351_v46 = vld [vmem:[%s688_s3 + $0x70] sm:$0xff] }
 0x108   :  { %v299_v33 = vadd.f32 %v298_v23, %v293_v17  ;;  %v302_v34 = vadd.f32 %v301_v25, %v296_v19  ;;  %v343_v7 = vmul.f32 %v342_v60, %v264_v57  ;;  %v266_v10 = vmax.f32 %v247_v0, 0.0 }
 0x109   :  { %v346_v14 = vmul.f32 %v345_v8, %v265_v3  ;;  %v349_v15 = vmul.f32 %v348_v9, %v265_v3  ;;  %v362_v28 = vand.u32 127, %v361_v26 }
 0x10a   :  { %v305_v40 = vadd.f32 %v304_v31, %v299_v33  ;;  %v308_v41 = vadd.f32 %v307_v32, %v302_v34  ;;  %v355_v19 = vmul.f32 %v354_v16, %v266_v10  ;;  %v352_v21 = vmul.f32 %v351_v46, %v266_v10 }
 0x10b   :  { %vm363_vm0 = vcmp.eq.s32.totalorder %v362_v28, 0 }
 0x10c   :  { %v311_v45 = vadd.f32 %v310_v35, %v305_v40  ;;  %v314_v47 = vadd.f32 %v313_v39, %v308_v41 }
 0x10e   :  { %v317_v50 = vadd.f32 %v316_v36, %v311_v45  ;;  %v320_v53 = vadd.f32 %v319_v37, %v314_v47 }
 0x110   :  { %v323_v62 = vadd.f32 %v322_v51, %v317_v50  ;;  %v326_v63 = vadd.f32 %v325_v56, %v320_v53 }
 0x112   :  { %v329_v4 = vadd.f32 %v328_v58, %v323_v62  ;;  %v332_v5 = vadd.f32 %v331_v61, %v326_v63 }
 0x114   :  { %v338_v11 = vadd.f32 %v337_v2, %v332_v5  ;;  %v335_v12 = vadd.f32 %v334_v1, %v329_v4 }
 0x116   :  { %v344_v13 = vadd.f32 %v343_v7, %v338_v11  ;;  %v341_v17 = vadd.f32 %v340_v6, %v335_v12 }
 0x118   :  { %v347_v20 = vadd.f32 %v346_v14, %v341_v17  ;;  %v350_v22 = vadd.f32 %v349_v15, %v344_v13 }
 0x11a   :  { %v353_v23 = vadd.f32 %v352_v21, %v347_v20  ;;  %v356_v25 = vadd.f32 %v355_v19, %v350_v22 }
 0x11c   :  { %357 = vadd.xlane.f32.xlu0 %v353_v23 }
 0x120   :  { %359 = vadd.xlane.f32.xlu0 %v356_v25 }
 0x1a9   :  { %v358_v29 = vpop.xlane.xlu0 %357 }
 0x1ad   :  { %v360_v30 = vpop.xlane.xlu0 %359 }
 0x1ae   :  { %v364_v31 = vsel %vm363_vm0, %v358_v29, %v360_v30 }
 0x1af   :  { %v372_v32 = vadd.f32 %v396_v27, %v364_v31 }
 0x1b1   :  { %374 = vst.msk [vmem:[%s691_s6] sm:$0xff] %vm373_vm1, %v372_v32 }

</bundles_post_ra>
